<compile_context>
chip_gen: v5e
topology: v5e:2x2
jax: 0.10.0
libtpu: 0.0.40
codegen_flags: <defaults>
</compile_context>

<pallas_src>
import functools
import math

import jax
import jax.numpy as jnp
from jax.experimental import pallas as pl
from jax.experimental.pallas import tpu as pltpu


# ----------------------------- conversion math ------------------------------ #

def _make_convert(in_dtype, out_dtype):
    """Return (kernel, jnp_fn) applying identical scale+cast math.

    `kernel` is the Pallas body (x_ref, o_ref); `jnp_fn` is the same elementwise
    math on plain arrays (used for the tiny-input fallback and the ragged tail),
    guaranteeing bit-identical results on both paths.
    """
    in_is_float = jnp.issubdtype(in_dtype, jnp.floating)
    out_is_float = jnp.issubdtype(out_dtype, jnp.floating)

    if in_is_float and out_is_float:
        def jnp_fn(x):
            return x.astype(out_dtype)
    elif (not in_is_float) and out_is_float:
        # Reciprocal multiply keeps the VPU slot cheap; <=1 ULP vs exact divide.
        recip_max = 1.0 / float(jnp.iinfo(in_dtype).max)

        def jnp_fn(x):
            return (x.astype(jnp.float32) * recip_max).astype(out_dtype)
    elif in_is_float and (not out_is_float):
        eps = 1e-3
        scale = float(jnp.iinfo(out_dtype).max) + 1.0 - eps

        def jnp_fn(x):
            return (x.astype(jnp.float32) * scale).astype(out_dtype)
    else:
        # TODO(synk): int -> int rescaling (bit-shift path) not implemented.
        raise NotImplementedError("int -> int conversion not implemented")

    def kernel(x_ref, o_ref):
        o_ref[...] = jnp_fn(x_ref[...])

    return kernel, jnp_fn


# ----------------------------- tiling heuristics ----------------------------- #

_LANE_CANDIDATES = (8192, 4096, 2048, 1024, 512, 256, 128)
_SUBLANE_TILE = 32           # int8 packs [32, 128] per vreg
_SMALL_TOTAL_BYTES = 256 << 10   # below this, plain jnp beats a kernel launch
_MIN_GRID_STEPS = 4          # keep a pipeline + feed both v7x TensorCores


@functools.lru_cache(maxsize=None)
def _vmem_capacity_bytes():
    """Physical VMEM of the local chip; conservative default if query fails."""
    try:
        info = pltpu.get_tpu_info()
        cap = int(getattr(info, "vmem_capacity_bytes", 0))
        if cap > 0:
            return cap
    except Exception:
        pass
    return 64 << 20  # v7x-level (smallest current generation) -> safe everywhere


def _block_byte_budget():
    # ~1/5 of physical VMEM of (in + out) bytes per block (~2/5 once
    # double-buffered), clamped to [4, 16] MiB:
    #   v7x (64 MiB VMEM, 3.2 TB/s HBM)  -> ~12.8 MiB blocks
    #   v6e / v5e (128 MiB VMEM)         -> 16 MiB blocks (vmem limit raised below)
    cap = _vmem_capacity_bytes()
    return max(4 << 20, min(16 << 20, cap // 5))


def _vmem_limit_bytes(budget):
    # Double-buffered (in + out) blocks plus headroom; required on v5e whose
    # scoped-VMEM default is only 16 MiB, harmless elsewhere.
    cap = _vmem_capacity_bytes()
    return max(16 << 20, min(cap - (8 << 20), 2 * budget + (8 << 20)))


# ----------------------------- pallas runner --------------------------------- #

def _run_elementwise(kernel, x2d, out_dtype):
    """Run an elementwise kernel over a lane-dense 2D view, tiled over rows."""
    M, L = x2d.shape
    in_bytes = jnp.dtype(x2d.dtype).itemsize
    out_bytes = jnp.dtype(out_dtype).itemsize
    total = M * L

    budget = _block_byte_budget()
    elems_per_block = budget // (in_bytes + out_bytes)
    tile_m = max(1, elems_per_block // L)

    # Keep >= ~4 grid steps when the array is big enough so double-buffering
    # has a pipeline to hide behind and both v7x TensorCores get work.
    if M >= _MIN_GRID_STEPS * _SUBLANE_TILE:
        tile_m = min(tile_m, max(_SUBLANE_TILE, pl.cdiv(M, _MIN_GRID_STEPS)))

    tile_m = max(_SUBLANE_TILE, (tile_m // _SUBLANE_TILE) * _SUBLANE_TILE)
    if tile_m >= M:
        tile_m = M  # block == full array extent: always a legal block shape

    grid = (pl.cdiv(M, tile_m),)  # ragged last block is fine for elementwise

    return pl.pallas_call(
        kernel,
        out_shape=jax.ShapeDtypeStruct((M, L), out_dtype),
        grid_spec=pltpu.PrefetchScalarGridSpec(
            num_scalar_prefetch=0,
            grid=grid,
            in_specs=[pl.BlockSpec((tile_m, L), lambda i: (i, 0))],
            out_specs=pl.BlockSpec((tile_m, L), lambda i: (i, 0)),
        ),
        compiler_params=pltpu.CompilerParams(
            dimension_semantics=("parallel",),        # shards loop over v7x's 2 TCs
            vmem_limit_bytes=_vmem_limit_bytes(budget)),
        cost_estimate=pl.CostEstimate(                # bandwidth-bound hint for XLA
            flops=total,
            transcendentals=0,
            bytes_accessed=total * (in_bytes + out_bytes)),
    )(x2d)


# ----------------------------- public wrapper -------------------------------- #

def convert_image_dtype(image, dtype=jnp.float32):
    """JAX/Pallas equivalent of torchvision F.convert_image_dtype."""
    in_dtype = image.dtype
    out_dtype = jnp.dtype(dtype)

    if in_dtype == out_dtype:
        return image

    kernel, jnp_fn = _make_convert(in_dtype, out_dtype)

    orig_shape = image.shape
    total = math.prod(orig_shape) if orig_shape else 1
    in_bytes = jnp.dtype(in_dtype).itemsize
    out_bytes = out_dtype.itemsize

    # Tiny inputs: kernel launch + pipeline prologue/epilogue dominate; let XLA
    # fuse the scale+cast instead.
    if total * (in_bytes + out_bytes) < _SMALL_TOTAL_BYTES or total < _LANE_CANDIDATES[-1]:
        return jnp_fn(image)

    flat = image.reshape(total)  # contiguous reshape: free (no HBM pass)

    # Lane-dense view: prefer the widest L (multiple of 128) that divides the
    # element count exactly -> zero wrapper-level copies.
    L = None
    for cand in _LANE_CANDIDATES:
        if total >= cand and total % cand == 0:
            L = cand
            break
    if L is None:
        # Ragged total: widest L that fits; prefix goes through Pallas, the
        # (< L)-element tail through jnp.  (No jnp.pad of the input and no
        # output slice -> no full extra HBM passes over the tensor.)
        for cand in _LANE_CANDIDATES:
            if total >= cand:
                L = cand
                break

    prefix = (total // L) * L

    if prefix == total:
        out2d = _run_elementwise(kernel, flat.reshape(-1, L), out_dtype)
        return out2d.reshape(orig_shape)

    head2d = _run_elementwise(kernel, flat[:prefix].reshape(-1, L), out_dtype)
    tail = jnp_fn(flat[prefix:])
    out_flat = jnp.concatenate([head2d.reshape(prefix), tail])
    return out_flat.reshape(orig_shape)


class ConvertImageDtype:
    """Mirror of the PyTorch module: returns (converted_image, target)."""

    def __init__(self, dtype=jnp.float32):
        self.dtype = dtype

    def __call__(self, image, target=None):
        return convert_image_dtype(image, self.dtype), target


# ----------------------------- main ------------------------------------------ #

if __name__ == "__main__":
    key = jax.random.PRNGKey(0)
    k1, k2, k3 = jax.random.split(key, 3)

    def ref_u8_to_f32(x):
        return x.astype(jnp.float32) / 255.0

    transform = ConvertImageDtype(jnp.float32)

    # 1) Tiny image (2,4,16,16): exercises the small-input jnp fallback path.
    img_small = jax.random.randint(k1, (2, 4, 16, 16), 0, 256, dtype=jnp.int32).astype(jnp.uint8)
    out_small, tgt = transform(img_small, target=None)
    out_small = jax.block_until_ready(out_small)
    assert tgt is None
    assert out_small.shape == img_small.shape and out_small.dtype == jnp.float32
    assert jnp.allclose(out_small, ref_u8_to_f32(img_small), atol=1e-6), "small u8->f32 mismatch"

    # 2) Pallas path, exactly divisible lane-dense view: (2,3,224,224) u8 -> f32,
    #    then f32 -> uint8 round-trip (float -> int kernel).
    img = jax.random.randint(k2, (2, 3, 224, 224), 0, 256, dtype=jnp.int32).astype(jnp.uint8)
    out, _ = transform(img, target=None)
    out = jax.block_until_ready(out)
    assert out.shape == img.shape and out.dtype == jnp.float32
    assert jnp.allclose(out, ref_u8_to_f32(img), atol=1e-6), "u8->f32 mismatch vs reference"

    back, _ = ConvertImageDtype(jnp.uint8)(out, target=None)
    back = jax.block_until_ready(back)
    scale = float(jnp.iinfo(jnp.uint8).max) + 1.0 - 1e-3
    ref_back = (out * scale).astype(jnp.uint8)
    assert back.shape == img.shape and back.dtype == jnp.uint8
    diff = jnp.abs(back.astype(jnp.int32) - ref_back.astype(jnp.int32))
    assert int(jnp.max(diff)) <= 1, "f32->u8 mismatch vs reference"

    # 3) Pallas path with a ragged tail (total % 128 != 0): (3,251,317) u8 -> f32.
    img_odd = jax.random.randint(k3, (3, 251, 317), 0, 256, dtype=jnp.int32).astype(jnp.uint8)
    out_odd, _ = transform(img_odd, target=None)
    out_odd = jax.block_until_ready(out_odd)
    assert out_odd.shape == img_odd.shape and out_odd.dtype == jnp.float32
    assert jnp.allclose(out_odd, ref_u8_to_f32(img_odd), atol=1e-6), "ragged u8->f32 mismatch"

    print("KERNEL_OK")
</pallas_src>

<mosaic_0001>
module attributes {stable_mosaic.version = 11 : i64} {
  func.func @kernel(%arg0: i32, %arg1: memref<32x2048xi8, #tpu.memory_space<vmem>>, %arg2: memref<32x2048xf32, #tpu.memory_space<vmem>>) attributes {dimension_semantics = [#tpu.dimension_semantics<parallel>], iteration_bounds = array<i64: 5>, scalar_prefetch = 0 : i64, scratch_operands = 0 : i64, tpu.core_type = #tpu.core_type<tc>, window_params = [{transform_indices = @transform_0, window_bounds = array<i64: 32, 2048>}, {transform_indices = @transform_1, window_bounds = array<i64: 32, 2048>}]} {
    %c0 = arith.constant 0 : index
    %c0_0 = arith.constant 0 : index
    %0 = vector.load %arg1[%c0, %c0_0] : memref<32x2048xi8, #tpu.memory_space<vmem>>, vector<32x2048xi8>
    %1 = arith.uitofp %0 : vector<32x2048xi8> to vector<32x2048xf32>
    %cst = arith.constant 0.00392156886 : f32
    %2 = vector.broadcast %cst : f32 to vector<32x2048xf32>
    %3 = arith.mulf %1, %2 : vector<32x2048xf32>
    %c0_1 = arith.constant 0 : index
    %c0_2 = arith.constant 0 : index
    %4 = vector.load %arg2[%c0_1, %c0_2] : memref<32x2048xf32, #tpu.memory_space<vmem>>, vector<32x2048xf32>
    tpu.vector_store %arg2[%c0_1, %c0_2], %3 {strides = array<i32>} : memref<32x2048xf32, #tpu.memory_space<vmem>>, vector<32x2048xf32>,
    return
  }
  func.func @transform_0(%arg0: i32) -> (i32, i32) {
    %c0_i32 = arith.constant 0 : i32
    %c0_i32_0 = arith.constant 0 : i32
    return %arg0, %c0_i32 : i32, i32
  }
  func.func @transform_1(%arg0: i32) -> (i32, i32) {
    %c0_i32 = arith.constant 0 : i32
    %c0_i32_0 = arith.constant 0 : i32
    return %arg0, %c0_i32 : i32, i32
  }
}

</mosaic_0001>

<bundles_post_ra>
// kernel: tpu_custom_call.1
= control target key start
LH: loop header
LB: loop body
LE: loop exit
PB: predicated region body
PF: predicated region fallthrough
CT: control target
= control target key end

     0   :  { %6 = vsyncpa [#allocation3], 0  ;;  %s1057_s0 = inlined_call_operand.hbm [shape: u8[147,2048], index: 0, kind: input, shape index: {}]   ;;  %s1058_s1 = inlined_call_operand.hbm [shape: f32[147,2048], index: 1, kind: output, shape index: {}]  }
   0x1   :  { %8 = vsyncpa [#allocation3 + $0x1], 0 }
   0x2   :  { %9 = vsyncpa [#allocation4], 0 }
   0x3   :  { %11 = vsyncpa [#allocation4 + $0x1], 0  ;;  %s801_s6 = smov 0   ;;  %s803_s7 = smov 0  }
   0x4   :  { %s805_s8 = smov 0   ;;  %s807_s9 = smov 0  }
   0x5 LB: > { %s822_s10 = sadd.s32 4294967295, %s783_s9   ;;  %s592_s11 = sadd.s32 4294967294, %s783_s9   ;;  %s783_s9 = sphi %s807_s9, %s1067_s9   ;;  %s779_s8 = sphi %s805_s8, %s1066_s8   ;;  %s775_s7 = sphi %s803_s7, %s1065_s7   ;;  %s771_s6 = sphi %s801_s6, %s1064_s6  }
   0x6   : > { %s826_s12 = sadd.s32 1, %s783_s9   ;;  %s24_s13 = sadd.s32 1, %s779_s8 }
   0x7   : > { %s21_s14 = ssub.s32 %s783_s9, %s826_s12  ;;  %p31_p0 = scmp.ne.s32.totalorder %s779_s8, %s775_s7 }
   0x8   : > { %p22_p1 = scmp.eq.s32.totalorder %s21_s14, 0  ;;  %p32_p2 = scmp.eq.s32.totalorder %s783_s9, 0 }
   0x9   : > { %p37_p3 = scmp.ne.s32.totalorder %s775_s7, %s771_s6  ;;  %p38_p4 = scmp.eq.s32.totalorder %s822_s10, 0 }
   0xa   : > { %s838_s15 = scalar_select %p22_p1, %s779_s8, %s24_s13  }
   0xb   : > { %p33_p5 = por %p32_p2, %p31_p0  ;;  %p840_p6 = por %p38_p4, %p37_p3 }
   0xc   : > { %p61_p7 = scmp.eq.s32.totalorder %s822_s10, 4  ;;  %p67_p8 = scmp.eq.s32.totalorder %s592_s11, 4 }
   0xd   : > { %p594_p11 = scmp.ge.s32.totalorder %s783_s9, 5 }
   0xe   : > { %p845_p9 = por %p61_p7, %p31_p0  ;;  %p849_p10 = por %p67_p8, %p37_p3 }
   0xf   : > { %83 = sbr.rel (%p594_p11) target bundleno = 56 (0x38), region = 16 }
  0x14   : > { %86 = sbr.rel (!%p33_p5) target bundleno = 56 (0x38), region = 20  ;;  %s87_s19 = sand.u32 (%p33_p5), 1, %s779_s8  }
  0x15   : > { %s596_s20 = sshll.u32 (%p33_p5), %s783_s9, 2  ;;  %s595_s21 = sshll.u32 (%p33_p5), %s87_s19, 7 }
  0x16   : > { %s93_s22 = ssub.s32 (%p33_p5), 19, %s596_s20  ;;  %s859_s26 = scalar_lea.sflag (%p33_p5), [#allocation3], %s87_s19 }
  0x17   : > { %p94_p12 = scmp.lt.s32.totalorder (%p33_p5), %s93_s22, 4  ;;  %s91_s27 = scalar_lea.vmem (%p33_p5), [#allocation2], %s595_s21 }
  0x19   : > { %s1069_s22 = smov (!%p94_p12, %s93_s22), 4 }
  0x1a   : > { %s618_s23 = sshll.u32 %s1069_s22, 5 }
  0x1b   : > { %s98_s24 = ssub.s32 128, %s618_s23 }
  0x1c   : > { %s99_s25 = sshll.u32 %s98_s24, 4 }
  0x1d   : > { %100 = vsyncadd %s859_s26, %s99_s25  ;;  %p862_p13 = scmp.ne.s32.totalorder %s618_s23, 0  ;;  %s620_s29 = sshll.u32 %s783_s9, 7 }
  0x1e   : > { %s104_s3 = scalar_lea.hbm %s1057_s0, %s620_s29  ;;  %s870_s4 = sshll.u32 %s91_s27, 4  ;;  %s109_s4 = int_to_ptr.vmem [resolvable:$true] %s870_s4 }
  0x1f   : > { %s106_s5 = sshll.u32 %s104_s3, 4  ;;  %s603_s11 = sshll.u32 %s1069_s22, 9  ;;  %s873_s5 = int_to_ptr.hbm [resolvable:$true] %s106_s5 }
  0x20   : > { %s667_s13 = sshra.s32 %s873_s5, 4  ;;  %s669_s14 = sshrl.u32 %s603_s11, 4  ;;  %s668_s13 = int_to_ptr.hbm [resolvable:$true] %s667_s13 }
  0x21   : > { %s674_s19 = scalar_lea.hbm %s668_s13, %s669_s14  ;;  %s678_s23 = scalar_lea.hbm %s1057_s0, 608 }
  0x22   : > { %p675_p0 = scmp.ne.s32.totalorder %s668_s13, %s674_s19  ;;  %p679_p3 = scmp.lt.s32.totalorder %s668_s13, %s1057_s0 }
  0x23   : > { %p680_p4 = scmp.lt.s32.totalorder %s678_s23, %s674_s19 }
  0x24   : > { %p676_p1 = pnand %p675_p0, %p862_p13 }
  0x25   : > { %p681_p5 = por %p680_p4, %p679_p3 }
  0x26   : > { %p677_p2 = pneg %p676_p1 }
  0x28   : > { %p682_p7 = pnand %p681_p5, %p677_p2 }
  0x2a   : > { %685 = shalt.err (!%p682_p7)
}
  0x2b   : > { %s686_s27 = sshra.s32 %s109_s4, 4  ;;  %s785_s30 = smov [#allocation2]   ;;  %s687_s27 = int_to_ptr.vmem [resolvable:$true] %s686_s27 }
  0x2c   : > { %s693_s29 = scalar_lea.vmem %s687_s27, %s669_s14  ;;  %s697_s2 = scalar_lea.vmem %s785_s30, 256 }
  0x2d   : > { %p694_p8 = scmp.ne.s32.totalorder %s687_s27, %s693_s29  ;;  %p699_p0 = scmp.lt.s32.totalorder %s697_s2, %s693_s29 }
  0x2f   : > { %p695_p11 = pnand %p694_p8, %p862_p13 }
  0x31   : > { %p696_p12 = pneg %p695_p11 }
  0x33   : > { %p701_p1 = pnand %p699_p0, %p696_p12 }
  0x35   : > { %704 = shalt.err (!%p701_p1)
}
  0x36   : > { %s786_s3 = smov 512   ;;  %s787_s13 = smov 32  }
  0x37   : > { %114 = dma.hbm_to_vmem [thread:$0]  (%p862_p13), %s873_s5, %s603_s11, %s109_s4, %s859_s26, %s786_s3, %s786_s3, %s787_s13  }
  0x38 PF: > { %p604_p2 = scmp.ge.s32.totalorder %s783_s9, 1  ;;  %p116_p3 = scmp.lt.s32.totalorder %s783_s9, 6 }
  0x3a   : > { %p117_p4 = pnand %p604_p2, %p116_p3 }
  0x3b   : > { %s902_s14 = sand.u32 (!%p117_p4), 1, %s775_s7  }
  0x3c   : > { %120 = sbr.rel (%p117_p4) target bundleno = 170 (0xaa), region = 24  ;;  %s605_s19 = sshll.u32 (!%p117_p4), %s902_s14, 7 }
  0x3d   : > { %s123_s20 = scalar_lea.sflag (!%p117_p4), [#allocation3], %s902_s14  ;;  %s906_s28 = scalar_lea.vmem (!%p117_p4), [#allocation2], %s605_s19 }
  0x41   : > { %762 = dma.done.wait (%p840_p6), %s123_s20, 2048  }
  0x42   : > { %764 = vsyncadd (%p840_p6), %s123_s20, 4294965248  ;;  %v158_v0 = vld [vmem:[%s906_s28] sm:$0xff]  ;;  %v159_v1 = vld [vmem:[%s906_s28 + $0x8] sm:$0xff]  ;;  %s606_s22 = sshll.u32 %s902_s14, 9  ;;  %s495_s26 = scalar_lea.sflag [#allocation4], %s902_s14 }
  0x43   : > { %v174_v2 = vunpack.c.0.s8 %v158_v0  ;;  %v175_v3 = vunpack.c.1.s8 %v158_v0  ;;  %v176_v4 = vunpack.c.2.s8 %v158_v0  ;;  %v177_v5 = vunpack.c.3.s8 %v158_v0  ;;  %v160_v18 = vld [vmem:[%s906_s28 + $0x10] sm:$0xff]  ;;  %v161_v27 = vld [vmem:[%s906_s28 + $0x18] sm:$0xff]  ;;  %s917_s16 = scalar_lea.vmem [#allocation5], %s606_s22  ;;  %v162_v52 = vld [vmem:[%s906_s28 + $0x20] sm:$0xff]  ;;  %s608_s4 = sshll.u32 (%p845_p9), %s822_s10, 2 }
  0x44   : > { %v178_v6 = vunpack.c.0.s8 %v159_v1  ;;  %v179_v7 = vunpack.c.1.s8 %v159_v1  ;;  %v180_v8 = vunpack.c.2.s8 %v159_v1  ;;  %v181_v9 = vunpack.c.3.s8 %v159_v1  ;;  %v163_v1 = vld [vmem:[%s906_s28 + $0x28] sm:$0xff]  ;;  %s503_s5 = ssub.s32 (%p845_p9), 19, %s608_s4 }
  0x45   : > { %v238_v10 = vand.u32 255, %v174_v2  ;;  %v239_v11 = vand.u32 255, %v175_v3  ;;  %v240_v12 = vand.u32 255, %v176_v4  ;;  %v241_v13 = vand.u32 255, %v177_v5  ;;  %p504_p6 = scmp.lt.s32.totalorder (%p845_p9), %s503_s5, 4 }
  0x46   : > { %v242_v14 = vand.u32 255, %v178_v6  ;;  %v243_v15 = vand.u32 255, %v179_v7  ;;  %v244_v16 = vand.u32 255, %v180_v8  ;;  %v245_v17 = vand.u32 255, %v181_v9 }
  0x47   : > { %v302_v19 = vcvt.s32.f32 %v238_v10  ;;  %v303_v20 = vcvt.s32.f32 %v239_v11  ;;  %v304_v21 = vcvt.s32.f32 %v240_v12  ;;  %v305_v22 = vcvt.s32.f32 %v241_v13 }
  0x48   : > { %v306_v23 = vcvt.s32.f32 %v242_v14  ;;  %v307_v24 = vcvt.s32.f32 %v243_v15  ;;  %v308_v25 = vcvt.s32.f32 %v244_v16  ;;  %v309_v26 = vcvt.s32.f32 %v245_v17 }
  0x49   : > { %v366_v28 = vmul.f32 0.003921569, %v302_v19  ;;  %v367_v29 = vmul.f32 0.003921569, %v303_v20  ;;  %v368_v30 = vmul.f32 0.003921569, %v304_v21  ;;  %v182_v31 = vunpack.c.0.s8 %v160_v18 }
  0x4a   : > { %v369_v32 = vmul.f32 0.003921569, %v305_v22  ;;  %v370_v33 = vmul.f32 0.003921569, %v306_v23  ;;  %v371_v34 = vmul.f32 0.003921569, %v307_v24  ;;  %v183_v35 = vunpack.c.1.s8 %v160_v18 }
  0x4b   : > { %430 = vst [vmem:[%s917_s16] sm:$0xff] %v366_v28  ;;  %v372_v36 = vmul.f32 0.003921569, %v308_v25  ;;  %v373_v37 = vmul.f32 0.003921569, %v309_v26  ;;  %v246_v38 = vand.u32 255, %v182_v31  ;;  %v184_v39 = vunpack.c.2.s8 %v160_v18  ;;  %v164_v22 = vld [vmem:[%s906_s28 + $0x30] sm:$0xff] }
  0x4c   : > { %431 = vst [vmem:[%s917_s16 + $0x8] sm:$0xff] %v367_v29  ;;  %v247_v40 = vand.u32 255, %v183_v35  ;;  %v185_v41 = vunpack.c.3.s8 %v160_v18  ;;  %v186_v42 = vunpack.c.0.s8 %v161_v27  ;;  %v187_v43 = vunpack.c.1.s8 %v161_v27  ;;  %v165_v35 = vld [vmem:[%s906_s28 + $0x38] sm:$0xff] }
  0x4d   : > { %432 = vst [vmem:[%s917_s16 + $0x10] sm:$0xff] %v368_v30  ;;  %v310_v44 = vcvt.s32.f32 %v246_v38  ;;  %v248_v45 = vand.u32 255, %v184_v39  ;;  %v188_v46 = vunpack.c.2.s8 %v161_v27  ;;  %v189_v47 = vunpack.c.3.s8 %v161_v27 }
  0x4e   : > { %433 = vst [vmem:[%s917_s16 + $0x18] sm:$0xff] %v369_v32  ;;  %v311_v48 = vcvt.s32.f32 %v247_v40  ;;  %v249_v49 = vand.u32 255, %v185_v41  ;;  %v250_v50 = vand.u32 255, %v186_v42  ;;  %v251_v51 = vand.u32 255, %v187_v43 }
  0x4f   : > { %434 = vst [vmem:[%s917_s16 + $0x20] sm:$0xff] %v370_v33  ;;  %v374_v53 = vmul.f32 0.003921569, %v310_v44  ;;  %v312_v54 = vcvt.s32.f32 %v248_v45  ;;  %v252_v55 = vand.u32 255, %v188_v46  ;;  %v253_v56 = vand.u32 255, %v189_v47 }
  0x50   : > { %435 = vst [vmem:[%s917_s16 + $0x28] sm:$0xff] %v371_v34  ;;  %v375_v57 = vmul.f32 0.003921569, %v311_v48  ;;  %v313_v58 = vcvt.s32.f32 %v249_v49  ;;  %v314_v59 = vcvt.s32.f32 %v250_v50  ;;  %v315_v60 = vcvt.s32.f32 %v251_v51 }
  0x51   : > { %436 = vst [vmem:[%s917_s16 + $0x30] sm:$0xff] %v372_v36  ;;  %v376_v61 = vmul.f32 0.003921569, %v312_v54  ;;  %v316_v62 = vcvt.s32.f32 %v252_v55  ;;  %v317_v63 = vcvt.s32.f32 %v253_v56  ;;  %v190_v0 = vunpack.c.0.s8 %v162_v52  ;;  %v166_v56 = vld [vmem:[%s906_s28 + $0x40] sm:$0xff] }
  0x52   : > { %437 = vst [vmem:[%s917_s16 + $0x38] sm:$0xff] %v373_v37  ;;  %v377_v2 = vmul.f32 0.003921569, %v313_v58  ;;  %v378_v3 = vmul.f32 0.003921569, %v314_v59  ;;  %v191_v4 = vunpack.c.1.s8 %v162_v52  ;;  %v192_v5 = vunpack.c.2.s8 %v162_v52 }
  0x53   : > { %438 = vst [vmem:[%s917_s16 + $0x40] sm:$0xff] %v374_v53  ;;  %v379_v6 = vmul.f32 0.003921569, %v315_v60  ;;  %v380_v7 = vmul.f32 0.003921569, %v316_v62  ;;  %v254_v8 = vand.u32 255, %v190_v0  ;;  %v193_v9 = vunpack.c.3.s8 %v162_v52 }
  0x54   : > { %439 = vst [vmem:[%s917_s16 + $0x48] sm:$0xff] %v375_v57  ;;  %v381_v10 = vmul.f32 0.003921569, %v317_v63  ;;  %v255_v11 = vand.u32 255, %v191_v4  ;;  %v256_v12 = vand.u32 255, %v192_v5  ;;  %v194_v13 = vunpack.c.0.s8 %v163_v1  ;;  %v167_v5 = vld [vmem:[%s906_s28 + $0x48] sm:$0xff] }
  0x55   : > { %440 = vst [vmem:[%s917_s16 + $0x50] sm:$0xff] %v376_v61  ;;  %v318_v14 = vcvt.s32.f32 %v254_v8  ;;  %v257_v15 = vand.u32 255, %v193_v9  ;;  %v195_v16 = vunpack.c.1.s8 %v163_v1  ;;  %v196_v17 = vunpack.c.2.s8 %v163_v1 }
  0x56   : > { %441 = vst [vmem:[%s917_s16 + $0x58] sm:$0xff] %v377_v2  ;;  %v319_v18 = vcvt.s32.f32 %v255_v11  ;;  %v320_v19 = vcvt.s32.f32 %v256_v12  ;;  %v258_v20 = vand.u32 255, %v194_v13  ;;  %v197_v21 = vunpack.c.3.s8 %v163_v1 }
  0x57   : > { %442 = vst [vmem:[%s917_s16 + $0x60] sm:$0xff] %v378_v3  ;;  %v382_v23 = vmul.f32 0.003921569, %v318_v14  ;;  %v321_v24 = vcvt.s32.f32 %v257_v15  ;;  %v259_v25 = vand.u32 255, %v195_v16  ;;  %v260_v26 = vand.u32 255, %v196_v17 }
  0x58   : > { %443 = vst [vmem:[%s917_s16 + $0x68] sm:$0xff] %v379_v6  ;;  %v383_v27 = vmul.f32 0.003921569, %v319_v18  ;;  %v384_v28 = vmul.f32 0.003921569, %v320_v19  ;;  %v322_v29 = vcvt.s32.f32 %v258_v20  ;;  %v261_v30 = vand.u32 255, %v197_v21 }
  0x59   : > { %444 = vst [vmem:[%s917_s16 + $0x70] sm:$0xff] %v380_v7  ;;  %v385_v31 = vmul.f32 0.003921569, %v321_v24  ;;  %v323_v32 = vcvt.s32.f32 %v259_v25  ;;  %v324_v33 = vcvt.s32.f32 %v260_v26  ;;  %v198_v34 = vunpack.c.0.s8 %v164_v22  ;;  %v168_v26 = vld [vmem:[%s906_s28 + $0x50] sm:$0xff] }
  0x5a   : > { %445 = vst [vmem:[%s917_s16 + $0x78] sm:$0xff] %v381_v10  ;;  %v386_v36 = vmul.f32 0.003921569, %v322_v29  ;;  %v325_v37 = vcvt.s32.f32 %v261_v30  ;;  %v199_v38 = vunpack.c.1.s8 %v164_v22  ;;  %v200_v39 = vunpack.c.2.s8 %v164_v22 }
  0x5b   : > { %446 = vst [vmem:[%s917_s16 + $0x80] sm:$0xff] %v382_v23  ;;  %v387_v40 = vmul.f32 0.003921569, %v323_v32  ;;  %v388_v41 = vmul.f32 0.003921569, %v324_v33  ;;  %v262_v42 = vand.u32 255, %v198_v34  ;;  %v201_v43 = vunpack.c.3.s8 %v164_v22 }
  0x5c   : > { %447 = vst [vmem:[%s917_s16 + $0x88] sm:$0xff] %v383_v27  ;;  %v389_v44 = vmul.f32 0.003921569, %v325_v37  ;;  %v263_v45 = vand.u32 255, %v199_v38  ;;  %v264_v46 = vand.u32 255, %v200_v39  ;;  %v202_v47 = vunpack.c.0.s8 %v165_v35  ;;  %v169_v39 = vld [vmem:[%s906_s28 + $0x58] sm:$0xff] }
  0x5d   : > { %448 = vst [vmem:[%s917_s16 + $0x90] sm:$0xff] %v384_v28  ;;  %v326_v48 = vcvt.s32.f32 %v262_v42  ;;  %v265_v49 = vand.u32 255, %v201_v43  ;;  %v203_v50 = vunpack.c.1.s8 %v165_v35  ;;  %v204_v51 = vunpack.c.2.s8 %v165_v35 }
  0x5e   : > { %449 = vst [vmem:[%s917_s16 + $0x98] sm:$0xff] %v385_v31  ;;  %v327_v52 = vcvt.s32.f32 %v263_v45  ;;  %v328_v53 = vcvt.s32.f32 %v264_v46  ;;  %v266_v54 = vand.u32 255, %v202_v47  ;;  %v205_v55 = vunpack.c.3.s8 %v165_v35 }
  0x5f   : > { %450 = vst [vmem:[%s917_s16 + $0xa0] sm:$0xff] %v386_v36  ;;  %v390_v57 = vmul.f32 0.003921569, %v326_v48  ;;  %v329_v58 = vcvt.s32.f32 %v265_v49  ;;  %v267_v59 = vand.u32 255, %v203_v50  ;;  %v268_v60 = vand.u32 255, %v204_v51 }
  0x60   : > { %451 = vst [vmem:[%s917_s16 + $0xa8] sm:$0xff] %v387_v40  ;;  %v391_v61 = vmul.f32 0.003921569, %v327_v52  ;;  %v392_v62 = vmul.f32 0.003921569, %v328_v53  ;;  %v330_v63 = vcvt.s32.f32 %v266_v54  ;;  %v269_v0 = vand.u32 255, %v205_v55 }
  0x61   : > { %452 = vst [vmem:[%s917_s16 + $0xb0] sm:$0xff] %v388_v41  ;;  %v393_v1 = vmul.f32 0.003921569, %v329_v58  ;;  %v331_v2 = vcvt.s32.f32 %v267_v59  ;;  %v332_v3 = vcvt.s32.f32 %v268_v60  ;;  %v206_v4 = vunpack.c.0.s8 %v166_v56  ;;  %v170_v60 = vld [vmem:[%s906_s28 + $0x60] sm:$0xff] }
  0x62   : > { %453 = vst [vmem:[%s917_s16 + $0xb8] sm:$0xff] %v389_v44  ;;  %v394_v6 = vmul.f32 0.003921569, %v330_v63  ;;  %v333_v7 = vcvt.s32.f32 %v269_v0  ;;  %v207_v8 = vunpack.c.1.s8 %v166_v56  ;;  %v208_v9 = vunpack.c.2.s8 %v166_v56 }
  0x63   : > { %454 = vst [vmem:[%s917_s16 + $0xc0] sm:$0xff] %v390_v57  ;;  %v395_v10 = vmul.f32 0.003921569, %v331_v2  ;;  %v396_v11 = vmul.f32 0.003921569, %v332_v3  ;;  %v270_v12 = vand.u32 255, %v206_v4  ;;  %v209_v13 = vunpack.c.3.s8 %v166_v56 }
  0x64   : > { %455 = vst [vmem:[%s917_s16 + $0xc8] sm:$0xff] %v391_v61  ;;  %v397_v14 = vmul.f32 0.003921569, %v333_v7  ;;  %v271_v15 = vand.u32 255, %v207_v8  ;;  %v272_v16 = vand.u32 255, %v208_v9  ;;  %v210_v17 = vunpack.c.0.s8 %v167_v5  ;;  %v171_v9 = vld [vmem:[%s906_s28 + $0x68] sm:$0xff] }
  0x65   : > { %456 = vst [vmem:[%s917_s16 + $0xd0] sm:$0xff] %v392_v62  ;;  %v334_v18 = vcvt.s32.f32 %v270_v12  ;;  %v273_v19 = vand.u32 255, %v209_v13  ;;  %v211_v20 = vunpack.c.1.s8 %v167_v5  ;;  %v212_v21 = vunpack.c.2.s8 %v167_v5 }
  0x66   : > { %457 = vst [vmem:[%s917_s16 + $0xd8] sm:$0xff] %v393_v1  ;;  %v335_v22 = vcvt.s32.f32 %v271_v15  ;;  %v336_v23 = vcvt.s32.f32 %v272_v16  ;;  %v274_v24 = vand.u32 255, %v210_v17  ;;  %v213_v25 = vunpack.c.3.s8 %v167_v5 }
  0x67   : > { %458 = vst [vmem:[%s917_s16 + $0xe0] sm:$0xff] %v394_v6  ;;  %v398_v27 = vmul.f32 0.003921569, %v334_v18  ;;  %v337_v28 = vcvt.s32.f32 %v273_v19  ;;  %v275_v29 = vand.u32 255, %v211_v20  ;;  %v276_v30 = vand.u32 255, %v212_v21 }
  0x68   : > { %459 = vst [vmem:[%s917_s16 + $0xe8] sm:$0xff] %v395_v10  ;;  %v399_v31 = vmul.f32 0.003921569, %v335_v22  ;;  %v400_v32 = vmul.f32 0.003921569, %v336_v23  ;;  %v338_v33 = vcvt.s32.f32 %v274_v24  ;;  %v277_v34 = vand.u32 255, %v213_v25 }
  0x69   : > { %460 = vst [vmem:[%s917_s16 + $0xf0] sm:$0xff] %v396_v11  ;;  %v401_v35 = vmul.f32 0.003921569, %v337_v28  ;;  %v339_v36 = vcvt.s32.f32 %v275_v29  ;;  %v340_v37 = vcvt.s32.f32 %v276_v30  ;;  %v214_v38 = vunpack.c.0.s8 %v168_v26  ;;  %v172_v30 = vld [vmem:[%s906_s28 + $0x70] sm:$0xff] }
  0x6a   : > { %461 = vst [vmem:[%s917_s16 + $0xf8] sm:$0xff] %v397_v14  ;;  %v402_v40 = vmul.f32 0.003921569, %v338_v33  ;;  %v341_v41 = vcvt.s32.f32 %v277_v34  ;;  %v215_v42 = vunpack.c.1.s8 %v168_v26  ;;  %v216_v43 = vunpack.c.2.s8 %v168_v26 }
  0x6b   : > { %462 = vst [vmem:[%s917_s16 + $0x100] sm:$0xff] %v398_v27  ;;  %v403_v44 = vmul.f32 0.003921569, %v339_v36  ;;  %v404_v45 = vmul.f32 0.003921569, %v340_v37  ;;  %v278_v46 = vand.u32 255, %v214_v38  ;;  %v217_v47 = vunpack.c.3.s8 %v168_v26 }
  0x6c   : > { %463 = vst [vmem:[%s917_s16 + $0x108] sm:$0xff] %v399_v31  ;;  %v405_v48 = vmul.f32 0.003921569, %v341_v41  ;;  %v279_v49 = vand.u32 255, %v215_v42  ;;  %v280_v50 = vand.u32 255, %v216_v43  ;;  %v218_v51 = vunpack.c.0.s8 %v169_v39  ;;  %v173_v43 = vld [vmem:[%s906_s28 + $0x78] sm:$0xff] }
  0x6d   : > { %464 = vst [vmem:[%s917_s16 + $0x110] sm:$0xff] %v400_v32  ;;  %v342_v52 = vcvt.s32.f32 %v278_v46  ;;  %v281_v53 = vand.u32 255, %v217_v47  ;;  %v219_v54 = vunpack.c.1.s8 %v169_v39  ;;  %v220_v55 = vunpack.c.2.s8 %v169_v39 }
  0x6e   : > { %465 = vst [vmem:[%s917_s16 + $0x118] sm:$0xff] %v401_v35  ;;  %v343_v56 = vcvt.s32.f32 %v279_v49  ;;  %v344_v57 = vcvt.s32.f32 %v280_v50  ;;  %v282_v58 = vand.u32 255, %v218_v51  ;;  %v221_v59 = vunpack.c.3.s8 %v169_v39 }
  0x6f   : > { %466 = vst [vmem:[%s917_s16 + $0x120] sm:$0xff] %v402_v40  ;;  %v406_v61 = vmul.f32 0.003921569, %v342_v52  ;;  %v345_v62 = vcvt.s32.f32 %v281_v53  ;;  %v283_v63 = vand.u32 255, %v219_v54  ;;  %v284_v0 = vand.u32 255, %v220_v55 }
  0x70   : > { %467 = vst [vmem:[%s917_s16 + $0x128] sm:$0xff] %v403_v44  ;;  %v407_v1 = vmul.f32 0.003921569, %v343_v56  ;;  %v408_v2 = vmul.f32 0.003921569, %v344_v57  ;;  %v346_v3 = vcvt.s32.f32 %v282_v58  ;;  %v285_v4 = vand.u32 255, %v221_v59 }
  0x71   : > { %468 = vst [vmem:[%s917_s16 + $0x130] sm:$0xff] %v404_v45  ;;  %v409_v5 = vmul.f32 0.003921569, %v345_v62  ;;  %v347_v6 = vcvt.s32.f32 %v283_v63  ;;  %v348_v7 = vcvt.s32.f32 %v284_v0  ;;  %v222_v8 = vunpack.c.0.s8 %v170_v60 }
  0x72   : > { %469 = vst [vmem:[%s917_s16 + $0x138] sm:$0xff] %v405_v48  ;;  %v410_v10 = vmul.f32 0.003921569, %v346_v3  ;;  %v349_v11 = vcvt.s32.f32 %v285_v4  ;;  %v223_v12 = vunpack.c.1.s8 %v170_v60  ;;  %v224_v13 = vunpack.c.2.s8 %v170_v60 }
  0x73   : > { %470 = vst [vmem:[%s917_s16 + $0x140] sm:$0xff] %v406_v61  ;;  %v411_v14 = vmul.f32 0.003921569, %v347_v6  ;;  %v412_v15 = vmul.f32 0.003921569, %v348_v7  ;;  %v286_v16 = vand.u32 255, %v222_v8  ;;  %v225_v17 = vunpack.c.3.s8 %v170_v60 }
  0x74   : > { %471 = vst [vmem:[%s917_s16 + $0x148] sm:$0xff] %v407_v1  ;;  %v413_v18 = vmul.f32 0.003921569, %v349_v11  ;;  %v287_v19 = vand.u32 255, %v223_v12  ;;  %v288_v20 = vand.u32 255, %v224_v13  ;;  %v226_v21 = vunpack.c.0.s8 %v171_v9 }
  0x75   : > { %472 = vst [vmem:[%s917_s16 + $0x150] sm:$0xff] %v408_v2  ;;  %v350_v22 = vcvt.s32.f32 %v286_v16  ;;  %v289_v23 = vand.u32 255, %v225_v17  ;;  %v227_v24 = vunpack.c.1.s8 %v171_v9  ;;  %v228_v25 = vunpack.c.2.s8 %v171_v9 }
  0x76   : > { %473 = vst [vmem:[%s917_s16 + $0x158] sm:$0xff] %v409_v5  ;;  %v351_v26 = vcvt.s32.f32 %v287_v19  ;;  %v352_v27 = vcvt.s32.f32 %v288_v20  ;;  %v290_v28 = vand.u32 255, %v226_v21  ;;  %v229_v29 = vunpack.c.3.s8 %v171_v9 }
  0x77   : > { %474 = vst [vmem:[%s917_s16 + $0x160] sm:$0xff] %v410_v10  ;;  %v414_v31 = vmul.f32 0.003921569, %v350_v22  ;;  %v353_v32 = vcvt.s32.f32 %v289_v23  ;;  %v291_v33 = vand.u32 255, %v227_v24  ;;  %v292_v34 = vand.u32 255, %v228_v25 }
  0x78   : > { %475 = vst [vmem:[%s917_s16 + $0x168] sm:$0xff] %v411_v14  ;;  %v415_v35 = vmul.f32 0.003921569, %v351_v26  ;;  %v416_v36 = vmul.f32 0.003921569, %v352_v27  ;;  %v354_v37 = vcvt.s32.f32 %v290_v28  ;;  %v293_v38 = vand.u32 255, %v229_v29 }
  0x79   : > { %476 = vst [vmem:[%s917_s16 + $0x170] sm:$0xff] %v412_v15  ;;  %v417_v39 = vmul.f32 0.003921569, %v353_v32  ;;  %v355_v40 = vcvt.s32.f32 %v291_v33  ;;  %v356_v41 = vcvt.s32.f32 %v292_v34  ;;  %v230_v42 = vunpack.c.0.s8 %v172_v30 }
  0x7a   : > { %477 = vst [vmem:[%s917_s16 + $0x178] sm:$0xff] %v413_v18  ;;  %v418_v44 = vmul.f32 0.003921569, %v354_v37  ;;  %v357_v45 = vcvt.s32.f32 %v293_v38  ;;  %v231_v46 = vunpack.c.1.s8 %v172_v30  ;;  %v232_v47 = vunpack.c.2.s8 %v172_v30 }
  0x7b   : > { %478 = vst [vmem:[%s917_s16 + $0x180] sm:$0xff] %v414_v31  ;;  %v419_v48 = vmul.f32 0.003921569, %v355_v40  ;;  %v420_v49 = vmul.f32 0.003921569, %v356_v41  ;;  %v294_v50 = vand.u32 255, %v230_v42  ;;  %v233_v51 = vunpack.c.3.s8 %v172_v30 }
  0x7c   : > { %479 = vst [vmem:[%s917_s16 + $0x188] sm:$0xff] %v415_v35  ;;  %v421_v52 = vmul.f32 0.003921569, %v357_v45  ;;  %v295_v53 = vand.u32 255, %v231_v46  ;;  %v296_v54 = vand.u32 255, %v232_v47  ;;  %v234_v55 = vunpack.c.0.s8 %v173_v43 }
  0x7d   : > { %480 = vst [vmem:[%s917_s16 + $0x190] sm:$0xff] %v416_v36  ;;  %v358_v56 = vcvt.s32.f32 %v294_v50  ;;  %v297_v57 = vand.u32 255, %v233_v51  ;;  %v235_v58 = vunpack.c.1.s8 %v173_v43  ;;  %v236_v59 = vunpack.c.2.s8 %v173_v43 }
  0x7e   : > { %481 = vst [vmem:[%s917_s16 + $0x198] sm:$0xff] %v417_v39  ;;  %v359_v60 = vcvt.s32.f32 %v295_v53  ;;  %v360_v61 = vcvt.s32.f32 %v296_v54  ;;  %v298_v62 = vand.u32 255, %v234_v55  ;;  %v237_v63 = vunpack.c.3.s8 %v173_v43 }
  0x7f   : > { %482 = vst [vmem:[%s917_s16 + $0x1a0] sm:$0xff] %v418_v44  ;;  %v422_v0 = vmul.f32 0.003921569, %v358_v56  ;;  %v361_v1 = vcvt.s32.f32 %v297_v57  ;;  %v299_v2 = vand.u32 255, %v235_v58  ;;  %v300_v3 = vand.u32 255, %v236_v59 }
  0x80   : > { %483 = vst [vmem:[%s917_s16 + $0x1a8] sm:$0xff] %v419_v48  ;;  %v423_v4 = vmul.f32 0.003921569, %v359_v60  ;;  %v362_v5 = vcvt.s32.f32 %v298_v62  ;;  %v301_v6 = vand.u32 255, %v237_v63  ;;  %v424_v7 = vmul.f32 0.003921569, %v360_v61 }
  0x81   : > { %484 = vst [vmem:[%s917_s16 + $0x1b0] sm:$0xff] %v420_v49  ;;  %v363_v8 = vcvt.s32.f32 %v299_v2  ;;  %v364_v9 = vcvt.s32.f32 %v300_v3  ;;  %v425_v10 = vmul.f32 0.003921569, %v361_v1 }
  0x82   : > { %485 = vst [vmem:[%s917_s16 + $0x1b8] sm:$0xff] %v421_v52  ;;  %v365_v11 = vcvt.s32.f32 %v301_v6  ;;  %v426_v12 = vmul.f32 0.003921569, %v362_v5 }
  0x83   : > { %486 = vst [vmem:[%s917_s16 + $0x1c0] sm:$0xff] %v422_v0  ;;  %v427_v13 = vmul.f32 0.003921569, %v363_v8  ;;  %v428_v14 = vmul.f32 0.003921569, %v364_v9 }
  0x84   : > { %487 = vst [vmem:[%s917_s16 + $0x1c8] sm:$0xff] %v423_v4  ;;  %v429_v15 = vmul.f32 0.003921569, %v365_v11 }
  0x85   : > { %488 = vst [vmem:[%s917_s16 + $0x1d0] sm:$0xff] %v424_v7 }
  0x86   : > { %489 = vst [vmem:[%s917_s16 + $0x1d8] sm:$0xff] %v425_v10  ;;  %501 = sbr.rel (!%p845_p9) target bundleno = 170 (0xaa), region = 32 }
  0x87   : > { %490 = vst [vmem:[%s917_s16 + $0x1e0] sm:$0xff] %v426_v12 }
  0x88   : > { %491 = vst [vmem:[%s917_s16 + $0x1e8] sm:$0xff] %v427_v13 }
  0x89   : > { %492 = vst [vmem:[%s917_s16 + $0x1f0] sm:$0xff] %v428_v14 }
  0x8a   : > { %493 = vst [vmem:[%s917_s16 + $0x1f8] sm:$0xff] %v429_v15 }
  0x8b   : > { %s1071_s5 = smov (!%p504_p6, %s503_s5), 4 }
  0x8c   : > { %s621_s11 = sshll.u32 %s1071_s5, 7 }
  0x8d   : > { %s508_s21 = ssub.s32 512, %s621_s11 }
  0x8e   : > { %s509_s23 = sshll.u32 %s508_s21, 4 }
  0x8f   : > { %510 = vsyncadd %s495_s26, %s509_s23  ;;  %p1004_p13 = scmp.ne.s32.totalorder %s621_s11, 0  ;;  %s623_s24 = sshll.u32 %s822_s10, 9 }
  0x90   : > { %s514_s29 = scalar_lea.hbm %s1058_s1, %s623_s24  ;;  %s516_s30 = sshll.u32 %s917_s16, 4  ;;  %s1013_s30 = int_to_ptr.vmem [resolvable:$true] %s516_s30 }
  0x91   : > { %s518_s2 = sshll.u32 %s514_s29, 4  ;;  %s615_s3 = sshll.u32 %s1071_s5, 11  ;;  %s1015_s2 = int_to_ptr.hbm [resolvable:$true] %s518_s2 }
  0x92   : > { %s706_s13 = sshra.s32 %s1013_s30, 4  ;;  %s708_s19 = sshrl.u32 %s615_s3, 4  ;;  %s707_s13 = int_to_ptr.vmem [resolvable:$true] %s706_s13 }
  0x93   : > { %s713_s20 = scalar_lea.vmem %s707_s13, %s708_s19  ;;  %s788_s10 = smov [#allocation5]  }
  0x94   : > { %p714_p9 = scmp.ne.s32.totalorder %s707_s13, %s713_s20  ;;  %s717_s28 = scalar_lea.vmem %s788_s10, 1024 }
  0x95   : > { %p719_p8 = scmp.lt.s32.totalorder %s717_s28, %s713_s20 }
  0x96   : > { %p715_p5 = pnand %p714_p9, %p1004_p13 }
  0x98   : > { %p716_p7 = pneg %p715_p5 }
  0x9a   : > { %p721_p11 = pnand %p719_p8, %p716_p7 }
  0x9c   : > { %724 = shalt.err (!%p721_p11)
}
  0x9d   : > { %s725_s22 = sshra.s32 %s1015_s2, 4  ;;  %s736_s21 = scalar_lea.hbm %s1058_s1, 2432  ;;  %s726_s22 = int_to_ptr.hbm [resolvable:$true] %s725_s22 }
  0x9e   : > { %s732_s16 = scalar_lea.hbm %s726_s22, %s708_s19  ;;  %p737_p2 = scmp.lt.s32.totalorder %s726_s22, %s1058_s1 }
  0x9f   : > { %p733_p12 = scmp.ne.s32.totalorder %s726_s22, %s732_s16  ;;  %p738_p3 = scmp.lt.s32.totalorder %s736_s21, %s732_s16 }
  0xa1   : > { %p734_p0 = pnand %p733_p12, %p1004_p13  ;;  %p739_p4 = por %p738_p3, %p737_p2 }
  0xa3   : > { %p735_p1 = pneg %p734_p0 }
  0xa5   : > { %p740_p6 = pnand %p739_p4, %p735_p1 }
  0xa7   : > { %743 = shalt.err (!%p740_p6)
}
  0xa8   : > { %s789_s25 = smov 2048   ;;  %s790_s27 = smov 128  }
  0xa9   : > { %524 = dma.vmem_to_hbm [thread:$0]  (%p1004_p13), %s1013_s30, %s615_s3, %s1015_s2, %s495_s26, %s789_s25, %s789_s25, %s790_s27  }
  0xaa PF: > { %p630_p9 = scmp.ge.s32.totalorder %s783_s9, 2  ;;  %s533_s29 = sand.u32 1, %s771_s6  }
  0xab   : > { %s534_s13 = scalar_lea.sflag [#allocation4], %s533_s29 }
  0xac   : > { %p627_p5 = pnand %p630_p9, %p849_p10 }
  0xae   : > { %p628_p7 = pneg %p627_p5 }
  0xb0   : > { %766 = dma.done.wait (%p628_p7), %s534_s13, 8192  }
  0xb1   : > { %768 = vsyncadd (%p628_p7), %s534_s13, 4294959104  ;;  %p14_p8 = scmp.ge.s32.totalorder %s826_s12, 7   ;;  %s1064_s6 = smov %s775_s7 }
  0xb2   : > { %s1065_s7 = smov %s779_s8  ;;  %s1066_s8 = smov %s838_s15 }
  0xb3   : > { %s1067_s9 = smov %s826_s12  ;;  %16 = sbr.rel (!%p14_p8) target bundleno = 5 (0x5), region = 69 }
  0xb8   :  { %540 = vsyncpa [#allocation3], 1 }
  0xb9   :  { %542 = vsyncpa [#allocation3 + $0x1], 1 }
  0xba   :  { %543 = vsyncpa [#allocation4], 1 }
  0xbb   :  { %545 = vsyncpa [#allocation4 + $0x1], 1 }

</bundles_post_ra>
